<compile_context>
chip_gen: v7x
topology: tpu7x:2x2x1
jax: 0.10.0
libtpu: 0.0.40
codegen_flags: <defaults>
</compile_context>

<pallas_src>
from functools import partial

import numpy as np
import jax
import jax.numpy as jnp
from jax.experimental import pallas as pl
from jax.experimental.pallas import tpu as pltpu


def _round_up(x, m):
    return ((x + m - 1) // m) * m


# ----------------------------------------------------------------------------
# Kernel 1: frozen conv backbone (im2col matmul) + ReLU + global average pool
# ----------------------------------------------------------------------------
def conv_gap_kernel(patches_ref, cw_ref, cb_ref, feats_ref, acc_ref, *,
                    chunk, tile_rows, hw, inv_hw, need_mask):
    r = pl.program_id(1)

    @pl.when(r == 0)
    def _init():
        acc_ref[...] = jnp.zeros_like(acc_ref)

    cw = cw_ref[...]                      # (KP, FEAT) bf16, VMEM-resident
    cb = cb_ref[...]                      # (1, FEAT)  f32

    n_chunks = tile_rows // chunk
    # Static (fully unrolled) chunk loop: keeps the f32 intermediate at
    # (chunk, FEAT) instead of (tile_rows, FEAT), and lets the VPU reduce of one
    # chunk co-issue under the MXU pushes of the next.
    for ci in range(n_chunks):
        x = patches_ref[0, ci * chunk:(ci + 1) * chunk, :]       # (chunk, KP) bf16
        h = jnp.dot(x, cw, preferred_element_type=jnp.float32)   # (chunk, FEAT) f32
        h = jnp.maximum(h + cb, 0.0)
        if need_mask:
            # Rows >= HW are zero-padded im2col rows; relu(0 @ cw + cb) is
            # generally nonzero, so exclude them from the GAP sum.
            rows = (r * tile_rows + ci * chunk
                    + jax.lax.broadcasted_iota(jnp.int32, (chunk, 1), 0))
            h = jnp.where(rows < hw, h, 0.0)
        # Sublane-wise partial sums into the (8, FEAT) accumulator (pure VPU
        # adds); the cross-sublane collapse happens once, at finalize.
        acc_ref[...] += jnp.sum(h.reshape(chunk // 8, 8, h.shape[-1]), axis=0)

    @pl.when(r == pl.num_programs(1) - 1)
    def _finalize():
        feats = jnp.sum(acc_ref[...], axis=0, keepdims=True) * inv_hw   # (1, FEAT)
        feats_ref[0] = feats.astype(feats_ref.dtype)


# ----------------------------------------------------------------------------
# Kernel 2: MLP head (fc1 -> relu -> fc2 -> relu -> fc3 -> tanh), batched over N
# ----------------------------------------------------------------------------
def actor_head_kernel(f_ref, w1_ref, b1_ref, w2_ref, b2_ref, w3_ref, b3_ref,
                      out_ref):
    x = f_ref[...].astype(jnp.bfloat16)                          # (N, 512)
    x1 = jnp.maximum(
        jnp.dot(x, w1_ref[...], preferred_element_type=jnp.float32)
        + b1_ref[...], 0.0)
    x2 = jnp.maximum(
        jnp.dot(x1.astype(jnp.bfloat16), w2_ref[...],
                preferred_element_type=jnp.float32) + b2_ref[...], 0.0)
    y = jnp.tanh(
        jnp.dot(x2.astype(jnp.bfloat16), w3_ref[...],
                preferred_element_type=jnp.float32) + b3_ref[...])
    out_ref[...] = y.astype(out_ref.dtype)


# ----------------------------------------------------------------------------
# JAX-side glue
# ----------------------------------------------------------------------------
def _im2col_3x3(state):
    """(N, C, H, W) -> (N, H*W, 9*C) patches for a 3x3, stride-1, pad-1 conv."""
    N, C, H, W = state.shape
    xp = jnp.pad(state, ((0, 0), (0, 0), (1, 1), (1, 1)))
    cols = [xp[:, :, kh:kh + H, kw:kw + W]
            for kh in range(3) for kw in range(3)]               # 9 x (N,C,H,W)
    patches = jnp.stack(cols, axis=1)                            # (N, 9, C, H, W)
    patches = patches.transpose(0, 3, 4, 1, 2)                   # (N, H, W, 9, C)
    return patches.reshape(N, H * W, 9 * C)


def actor_conv_forward(state, params, *, tile_rows=4096, chunk=256):
    """state: (N, C, H, W) float32 (NCHW, matching the PyTorch module)."""
    N, C, H, W = state.shape
    HW = H * W
    cw, cb, w1, b1, w2, b2, w3, b3 = params
    K = cw.shape[0]                      # 9 * C
    FEAT = cw.shape[1]                   # 512 backbone features
    D1, D2 = w1.shape[1], w2.shape[1]
    A = w3.shape[1]
    KP = _round_up(K, 32)                # small K pad only; never pad to MXU depth

    # --- row tiling: big tiles, HW padded up to a tile multiple (masked rows)
    chunk = _round_up(max(8, min(chunk, _round_up(HW, 8))), 8)
    tile_rows = min(_round_up(tile_rows, chunk), _round_up(HW, chunk))
    HW_pad = _round_up(HW, tile_rows)
    R = HW_pad // tile_rows
    need_mask = HW_pad != HW

    # im2col + row/K padding; bf16 MXU operands (accumulation stays f32 in-kernel)
    patches = _im2col_3x3(state)
    patches = jnp.pad(patches, ((0, 0), (0, HW_pad - HW), (0, KP - K)))
    patches = patches.astype(jnp.bfloat16)
    cw_p = jnp.pad(cw, ((0, KP - K), (0, 0))).astype(jnp.bfloat16)
    w1b = w1.astype(jnp.bfloat16)
    w2b = w2.astype(jnp.bfloat16)
    w3b = w3.astype(jnp.bfloat16)

    conv_kernel = partial(conv_gap_kernel, chunk=chunk, tile_rows=tile_rows,
                          hw=HW, inv_hw=np.float32(1.0 / HW),
                          need_mask=need_mask)

    conv_cost = pl.CostEstimate(
        flops=2 * N * HW_pad * KP * FEAT,
        transcendentals=0,
        bytes_accessed=int(N * HW_pad * KP * 2 + KP * FEAT * 2
                           + FEAT * 4 + N * FEAT * 4),
    )

    # Conv backbone + GAP: grid = (N parallel, row-tiles arbitrary); conv weight
    # stays VMEM-resident; lane-dense (1,1,512) feature output per batch element.
    feats = pl.pallas_call(
        conv_kernel,
        out_shape=jax.ShapeDtypeStruct((N, 1, FEAT), jnp.float32),
        grid_spec=pltpu.PrefetchScalarGridSpec(
            num_scalar_prefetch=0,
            grid=(N, R),
            in_specs=[
                pl.BlockSpec((1, tile_rows, KP), lambda n, r: (n, r, 0)),
                pl.BlockSpec(cw_p.shape, lambda n, r: (0, 0)),
                pl.BlockSpec(cb.shape, lambda n, r: (0, 0)),
            ],
            out_specs=pl.BlockSpec((1, 1, FEAT), lambda n, r: (n, 0, 0)),
            scratch_shapes=[pltpu.VMEM((8, FEAT), jnp.float32)],
        ),
        compiler_params=pltpu.CompilerParams(
            dimension_semantics=("parallel", "arbitrary"),
            vmem_limit_bytes=32 * 1024 * 1024),
        cost_estimate=conv_cost,
    )(patches, cw_p, cb)
    feats = feats.reshape(N, FEAT)

    head_cost = pl.CostEstimate(
        flops=2 * N * (FEAT * D1 + D1 * D2 + D2 * A),
        transcendentals=N * A,
        bytes_accessed=int(N * FEAT * 4 + (FEAT * D1 + D1 * D2 + D2 * A) * 2
                           + (D1 + D2 + A) * 4 + N * A * 4),
    )

    # MLP head: one tiny call, batched over all N states (everything in VMEM).
    out = pl.pallas_call(
        actor_head_kernel,
        out_shape=jax.ShapeDtypeStruct((N, A), jnp.float32),
        grid_spec=pltpu.PrefetchScalarGridSpec(
            num_scalar_prefetch=0,
            grid=(1,),
            in_specs=[
                pl.BlockSpec((N, FEAT), lambda i: (0, 0)),
                pl.BlockSpec(w1b.shape, lambda i: (0, 0)),
                pl.BlockSpec(b1.shape, lambda i: (0, 0)),
                pl.BlockSpec(w2b.shape, lambda i: (0, 0)),
                pl.BlockSpec(b2.shape, lambda i: (0, 0)),
                pl.BlockSpec(w3b.shape, lambda i: (0, 0)),
                pl.BlockSpec(b3.shape, lambda i: (0, 0)),
            ],
            out_specs=pl.BlockSpec((N, A), lambda i: (0, 0)),
        ),
        compiler_params=pltpu.CompilerParams(
            dimension_semantics=("arbitrary",),
            vmem_limit_bytes=32 * 1024 * 1024),
        cost_estimate=head_cost,
    )(feats, w1b, b1, w2b, b2, w3b, b3)
    return out


# ----------------------------------------------------------------------------
# Deterministic parameter init (shapes from the module; synthetic values)
# ----------------------------------------------------------------------------
def init_params(key, in_channels, action_size, fc1_units=512, fc2_units=256):
    backbone_out = 512                   # fc1 expects 512 input features
    ckk = in_channels * 9
    ks = jax.random.split(key, 8)

    def u(k, shape, lim):
        return jax.random.uniform(k, shape, jnp.float32, -lim, lim)

    cw = u(ks[0], (ckk, backbone_out), 1.0 / np.sqrt(ckk))
    cb = u(ks[1], (1, backbone_out), 1.0 / np.sqrt(ckk))
    # hidden_init uses weight.size()[0] == out_features as "fan_in"
    w1 = u(ks[2], (backbone_out, fc1_units), 1.0 / np.sqrt(fc1_units))
    b1 = u(ks[3], (1, fc1_units), 1.0 / np.sqrt(backbone_out))
    w2 = u(ks[4], (fc1_units, fc2_units), 1.0 / np.sqrt(fc2_units))
    b2 = u(ks[5], (1, fc2_units), 1.0 / np.sqrt(fc1_units))
    w3 = u(ks[6], (fc2_units, action_size), 0.003)
    b3 = u(ks[7], (1, action_size), 1.0 / np.sqrt(fc2_units))
    return (cw, cb, w1, b1, w2, b2, w3, b3)


# ----------------------------------------------------------------------------
# Pure-JAX reference (same math, same bf16 operand rounding) for a sanity check
# ----------------------------------------------------------------------------
def reference_forward(state, params):
    cw, cb, w1, b1, w2, b2, w3, b3 = params
    patches = _im2col_3x3(state).astype(jnp.bfloat16)            # (N, HW, 9C)
    h = jnp.maximum(
        jnp.einsum('nrk,kf->nrf', patches, cw.astype(jnp.bfloat16),
                   preferred_element_type=jnp.float32) + cb, 0.0)
    feats = jnp.mean(h, axis=1)                                  # (N, 512)
    x1 = jnp.maximum(
        jnp.dot(feats.astype(jnp.bfloat16), w1.astype(jnp.bfloat16),
                preferred_element_type=jnp.float32) + b1, 0.0)
    x2 = jnp.maximum(
        jnp.dot(x1.astype(jnp.bfloat16), w2.astype(jnp.bfloat16),
                preferred_element_type=jnp.float32) + b2, 0.0)
    return jnp.tanh(
        jnp.dot(x2.astype(jnp.bfloat16), w3.astype(jnp.bfloat16),
                preferred_element_type=jnp.float32) + b3)


if __name__ == "__main__":
    key = jax.random.PRNGKey(0)
    kA_state, kA_params, kB_state, kB_params = jax.random.split(key, 4)

    # Config A: NCHW like the PyTorch module; HW aligned (no padded-row path).
    N, C, H, W, A = 2, 4, 16, 16, 4
    state = jax.random.normal(kA_state, (N, C, H, W), jnp.float32)
    params = init_params(kA_params, C, A)
    out = jax.block_until_ready(actor_conv_forward(state, params))
    ref = reference_forward(state, params)
    assert out.shape == (N, A)
    assert np.allclose(np.asarray(out), np.asarray(ref, dtype=np.float32),
                       atol=1e-2), "Pallas output mismatch vs reference (A)"

    # Config B: HW=100 exercises the padded-row masking path (rows padded to 104).
    N2, C2, H2, W2, A2 = 2, 3, 10, 10, 6
    state2 = jax.random.normal(kB_state, (N2, C2, H2, W2), jnp.float32)
    params2 = init_params(kB_params, C2, A2)
    out2 = jax.block_until_ready(actor_conv_forward(state2, params2))
    ref2 = reference_forward(state2, params2)
    assert out2.shape == (N2, A2)
    assert np.allclose(np.asarray(out2), np.asarray(ref2, dtype=np.float32),
                       atol=1e-2), "Pallas output mismatch vs reference (B)"

    print("KERNEL_OK")
</pallas_src>

<mosaic_0001>
module attributes {stable_mosaic.version = 11 : i64} {
  func.func @conv_gap_kernel(%arg0: i32, %arg1: i32, %arg2: memref<1x256x64xbf16, #tpu.memory_space<vmem>>, %arg3: memref<64x512xbf16, #tpu.memory_space<vmem>>, %arg4: memref<1x512xf32, #tpu.memory_space<vmem>>, %arg5: memref<1x1x512xf32, #tpu.memory_space<vmem>>, %arg6: memref<8x512xf32, #tpu.memory_space<vmem>>) attributes {dimension_semantics = [#tpu.dimension_semantics<parallel>, #tpu.dimension_semantics<arbitrary>], iteration_bounds = array<i64: 2, 1>, scalar_prefetch = 0 : i64, scratch_operands = 1 : i64, tpu.core_type = #tpu.core_type<tc>, window_params = [{transform_indices = @transform_0, window_bounds = array<i64: 1, 256, 64>}, {pipeline_mode = #tpu.pipeline_mode<synchronous>, transform_indices = @transform_1, window_bounds = array<i64: 64, 512>}, {pipeline_mode = #tpu.pipeline_mode<synchronous>, transform_indices = @transform_2, window_bounds = array<i64: 1, 512>}, {transform_indices = @transform_3, window_bounds = array<i64: 1, 1, 512>}]} {
    %c0_i32 = arith.constant 0 : i32
    %0 = arith.cmpi eq, %arg1, %c0_i32 : i32
    %1 = arith.extui %0 : i1 to i32
    %c0_i32_0 = arith.constant 0 : i32
    %2 = arith.cmpi ne, %1, %c0_i32_0 : i32
    scf.if %2 {
      %cst_15 = arith.constant 0.000000e+00 : f32
      %20 = vector.broadcast %cst_15 : f32 to vector<8x512xf32>
      %c0_16 = arith.constant 0 : index
      %c0_17 = arith.constant 0 : index
      %21 = vector.load %arg6[%c0_16, %c0_17] : memref<8x512xf32, #tpu.memory_space<vmem>>, vector<8x512xf32>
      tpu.vector_store %arg6[%c0_16, %c0_17], %20 {strides = array<i32>} : memref<8x512xf32, #tpu.memory_space<vmem>>, vector<8x512xf32>,
    } else {
    }
    %c0 = arith.constant 0 : index
    %c0_1 = arith.constant 0 : index
    %3 = vector.load %arg3[%c0, %c0_1] : memref<64x512xbf16, #tpu.memory_space<vmem>>, vector<64x512xbf16>
    %c0_2 = arith.constant 0 : index
    %c0_3 = arith.constant 0 : index
    %4 = vector.load %arg4[%c0_2, %c0_3] : memref<1x512xf32, #tpu.memory_space<vmem>>, vector<1x512xf32>
    %c0_4 = arith.constant 0 : index
    %c0_5 = arith.constant 0 : index
    %c0_6 = arith.constant 0 : index
    %5 = vector.load %arg2[%c0_4, %c0_5, %c0_6] : memref<1x256x64xbf16, #tpu.memory_space<vmem>>, vector<1x256x64xbf16>
    %6 = vector.shape_cast %5 : vector<1x256x64xbf16> to vector<256x64xbf16>
    %cst = arith.constant dense<0.000000e+00> : vector<256x512xf32>
    %7 = tpu.matmul %6, %3, %cst {dimension_numbers = #tpu.dot_dimension_numbers<[1], [0], [0], [1], [0, 0, 1, 1], [], []>} : vector<256x64xbf16>, vector<64x512xbf16>, vector<256x512xf32> -> vector<256x512xf32>
    %8 = vector.broadcast %4 : vector<1x512xf32> to vector<256x512xf32>
    %9 = arith.addf %7, %8 : vector<256x512xf32>
    %cst_7 = arith.constant 0.000000e+00 : f32
    %10 = vector.broadcast %cst_7 : f32 to vector<256x512xf32>
    %11 = arith.maximumf %9, %10 : vector<256x512xf32>
    %c0_8 = arith.constant 0 : index
    %c0_9 = arith.constant 0 : index
    %12 = vector.load %arg6[%c0_8, %c0_9] : memref<8x512xf32, #tpu.memory_space<vmem>>, vector<8x512xf32>
    %13 = vector.shape_cast %11 : vector<256x512xf32> to vector<32x8x512xf32>
    %cst_10 = arith.constant dense<0.000000e+00> : vector<8x512xf32>
    %14 = vector.multi_reduction <add>, %13, %cst_10 [0] : vector<32x8x512xf32> to vector<8x512xf32>
    %15 = arith.addf %12, %14 : vector<8x512xf32>
    %c0_11 = arith.constant 0 : index
    %c0_12 = arith.constant 0 : index
    %16 = vector.load %arg6[%c0_11, %c0_12] : memref<8x512xf32, #tpu.memory_space<vmem>>, vector<8x512xf32>
    tpu.vector_store %arg6[%c0_11, %c0_12], %15 {strides = array<i32>} : memref<8x512xf32, #tpu.memory_space<vmem>>, vector<8x512xf32>,
    %c0_i32_13 = arith.constant 0 : i32
    %17 = arith.cmpi eq, %arg1, %c0_i32_13 : i32
    %18 = arith.extui %17 : i1 to i32
    %c0_i32_14 = arith.constant 0 : i32
    %19 = arith.cmpi ne, %18, %c0_i32_14 : i32
    scf.if %19 {
      %c0_15 = arith.constant 0 : index
      %c0_16 = arith.constant 0 : index
      %20 = vector.load %arg6[%c0_15, %c0_16] : memref<8x512xf32, #tpu.memory_space<vmem>>, vector<8x512xf32>
      %cst_17 = arith.constant dense<0.000000e+00> : vector<512xf32>
      %21 = vector.multi_reduction <add>, %20, %cst_17 [0] : vector<8x512xf32> to vector<512xf32>
      %22 = vector.shape_cast %21 : vector<512xf32> to vector<1x512xf32>
      %cst_18 = arith.constant 3.906250e-03 : f32
      %23 = vector.broadcast %cst_18 : f32 to vector<1x512xf32>
      %24 = arith.mulf %22, %23 : vector<1x512xf32>
      %c0_19 = arith.constant 0 : index
      %c0_20 = arith.constant 0 : index
      %c0_21 = arith.constant 0 : index
      %25 = vector.load %arg5[%c0_19, %c0_20, %c0_21] : memref<1x1x512xf32, #tpu.memory_space<vmem>>, vector<1x1x512xf32>
      %26 = vector.shape_cast %25 : vector<1x1x512xf32> to vector<1x512xf32>
      %27 = vector.shape_cast %24 : vector<1x512xf32> to vector<1x1x512xf32>
      tpu.vector_store %arg5[%c0_19, %c0_20, %c0_21], %27 {strides = array<i32>} : memref<1x1x512xf32, #tpu.memory_space<vmem>>, vector<1x1x512xf32>,
    } else {
    }
    return
  }
  func.func @transform_0(%arg0: i32, %arg1: i32) -> (i32, i32, i32) {
    %c0_i32 = arith.constant 0 : i32
    %c0_i32_0 = arith.constant 0 : i32
    return %arg0, %arg1, %c0_i32 : i32, i32, i32
  }
  func.func @transform_1(%arg0: i32, %arg1: i32) -> (i32, i32) {
    %c0_i32 = arith.constant 0 : i32
    %c0_i32_0 = arith.constant 0 : i32
    %c0_i32_1 = arith.constant 0 : i32
    return %c0_i32, %c0_i32_0 : i32, i32
  }
  func.func @transform_2(%arg0: i32, %arg1: i32) -> (i32, i32) {
    %c0_i32 = arith.constant 0 : i32
    %c0_i32_0 = arith.constant 0 : i32
    %c0_i32_1 = arith.constant 0 : i32
    return %c0_i32, %c0_i32_0 : i32, i32
  }
  func.func @transform_3(%arg0: i32, %arg1: i32) -> (i32, i32, i32) {
    %c0_i32 = arith.constant 0 : i32
    %c0_i32_0 = arith.constant 0 : i32
    %c0_i32_1 = arith.constant 0 : i32
    return %arg0, %c0_i32, %c0_i32_0 : i32, i32, i32
  }
}

</mosaic_0001>

<bundles_post_ra>
// kernel: tpu_custom_call.1
= control target key start
LH: loop header
LB: loop body
LE: loop exit
PB: predicated region body
PF: predicated region fallthrough
CT: control target
= control target key end

     0   :  { %8 = vsyncpa [#allocation4], 0  ;;  %s1961_s0 = inlined_call_operand.vmem [shape: bf16[2,256,64], index: 0, kind: input, shape index: {}]   ;;  %s1962_s1 = inlined_call_operand.vmem [shape: bf16[64,512], index: 1, kind: input, shape index: {}]   ;;  %s1963_s2 = inlined_call_operand.vmem [shape: f32[1,512], index: 2, kind: input, shape index: {}]   ;;  %s1964_s3 = inlined_call_operand.hbm [shape: f32[2,1,512], index: 3, kind: output, shape index: {}]  }
   0x1   :  { %10 = vsyncpa [#allocation4 + $0x1], 0  ;;  %s1571_s12 = smov 0   ;;  %s1573_s13 = smov 0  }
   0x2   :  { %s1575_s14 = smov 0   ;;  %s1577_s15 = smov 0  }
   0x3   :  { %s1579_s16 = smov 0   ;;  %s1581_s17 = smov 0  }
   0x4 LB: > { %s1292_s18 = sadd.s32 4294967295, %s1546_s17   ;;  %s1293_s19 = sadd.s32 4294967294, %s1546_s17   ;;  %s1546_s17 = sphi %s1581_s17, %s16_s17   ;;  %s1542_s16 = sphi %s1579_s16, %s1971_s16   ;;  %s1538_s15 = sphi %s1577_s15, %s1970_s15   ;;  %s1534_s14 = sphi %s1575_s14, %s1969_s14   ;;  %s1530_s13 = sphi %s1573_s13, %s1968_s13   ;;  %s1526_s12 = sphi %s1571_s12, %s1967_s12  }
   0x5   : > { %s28_s20 = sadd.s32 1, %s1542_s16  ;;  %s105_s21 = sadd.s32 1, %s1534_s14 }
   0x6   : > { %p30_p0 = scmp.ge.s32.totalorder %s28_s20, 2  ;;  %p115_p1 = scmp.ne.s32.totalorder %s1534_s14, %s1530_s13 }
   0x7   : > { %p116_p2 = scmp.eq.s32.totalorder %s1292_s18, 1  ;;  %p121_p3 = scmp.ne.s32.totalorder %s1530_s13, %s1526_s12 }
   0x8   : > { %s1973_s20 = smov (%p30_p0, %s28_s20), 0  ;;  %p122_p5 = scmp.eq.s32.totalorder %s1293_s19, 1 }
   0x9   : > { %p1611_p4 = por %p116_p2, %p115_p1  ;;  %s102_s23 = ssub.s32 %s1542_s16, %s1973_s20 }
   0xa   : > { %p1296_p6 = scmp.ge.s32.totalorder %s1546_s17, 1  ;;  %p103_p7 = scmp.eq.s32.totalorder %s102_s23, 0 }
   0xb   : > { %p1618_p8 = por %p122_p5, %p121_p3  ;;  %p159_p9 = scmp.lt.s32.totalorder %s1546_s17, 3 }
   0xc   : > { %s1624_s25 = scalar_select %p103_p7, %s1534_s14, %s105_s21  }
   0xd   : > { %p160_p10 = pnand %p1296_p6, %p159_p9 }
   0xe   : > { %v1428_v0 = vld [vmem:[%s1962_s1 + $0x4] ss:$16 sps:$4 sm:$0xff] (!%p160_p10)   ;;  %p188_p11 = scmp.lt.s32.totalorder (!%p160_p10), %s1538_s15, 1  ;;  %v1430_v1 = vld [vmem:[%s1962_s1 + $0xc] ss:$16 sps:$4 sm:$0xff] (!%p160_p10)   ;;  %v1548_v2 = vmov (!%p160_p10), 0   ;;  %v256_v33 = vlaneseq (!%p160_p10) }
   0xf   : > { %163 = sbr.rel (%p160_p10) target bundleno = 409 (0x199), region = 32  ;;  %517 = vmatprep.mubr.bf16.mxu0 (!%p160_p10), %v1548_v2  ;;  %710 = vmatprep.mubr.bf16.mxu1 (!%p160_p10), %v1548_v2  ;;  %v1432_v3 = vld [vmem:[%s1962_s1] ss:$16 sps:$4 sm:$0xff] (!%p160_p10)   ;;  %v1433_v4 = vld [vmem:[%s1962_s1 + $0x8] ss:$16 sps:$4 sm:$0xff] (!%p160_p10)   ;;  %vm436_vm0 = vcmask (!%p160_p10), 523264  }
  0x10   : > { %485 = vmatprep.subr.bf16.mxu0 (!%p160_p10), %v1428_v0  ;;  %678 = vmatprep.subr.bf16.mxu1 (!%p160_p10), %v1430_v1  ;;  %v1434_v5 = vld [vmem:[%s1962_s1 + $0x24] ss:$16 sps:$4 sm:$0xff] (!%p160_p10)   ;;  %v1436_v6 = vld [vmem:[%s1962_s1 + $0x2c] ss:$16 sps:$4 sm:$0xff] (!%p160_p10)   ;;  %v1438_v7 = vld [vmem:[%s1962_s1 + $0x20] ss:$16 sps:$4 sm:$0xff] (!%p160_p10)  }
  0x11   : > { %486 = vmatpush1.bf16.msra.mxu0 (!%p160_p10), %v1432_v3  ;;  %679 = vmatpush1.bf16.msra.mxu1 (!%p160_p10), %v1433_v4  ;;  %v1439_v8 = vld [vmem:[%s1962_s1 + $0x28] ss:$16 sps:$4 sm:$0xff] (!%p160_p10)   ;;  %v1440_v9 = vld [vmem:[%s1962_s1 + $0x44] ss:$16 sps:$4 sm:$0xff] (!%p160_p10)   ;;  %v1442_v10 = vld [vmem:[%s1962_s1 + $0x4c] ss:$16 sps:$4 sm:$0xff] (!%p160_p10)  }
  0x12   : > { %487 = vmatprep.subr.bf16.mxu0 (!%p160_p10), %v1434_v5  ;;  %680 = vmatprep.subr.bf16.mxu1 (!%p160_p10), %v1436_v6  ;;  %v1444_v11 = vld [vmem:[%s1962_s1 + $0x40] ss:$16 sps:$4 sm:$0xff] (!%p160_p10)   ;;  %v1445_v12 = vld [vmem:[%s1962_s1 + $0x48] ss:$16 sps:$4 sm:$0xff] (!%p160_p10)   ;;  %v1446_v13 = vld [vmem:[%s1962_s1 + $0x64] ss:$16 sps:$4 sm:$0xff] (!%p160_p10)  }
  0x13   : > { %v1448_v14 = vld [vmem:[%s1962_s1 + $0x6c] ss:$16 sps:$4 sm:$0xff] (!%p160_p10)   ;;  %v1450_v15 = vld [vmem:[%s1962_s1 + $0x60] ss:$16 sps:$4 sm:$0xff] (!%p160_p10)   ;;  %v1451_v16 = vld [vmem:[%s1962_s1 + $0x68] ss:$16 sps:$4 sm:$0xff] (!%p160_p10)  }
  0x14   : > { %v1762_v34 = vshrl.u32 (!%p160_p10), %v256_v33, 7  ;;  %v222_v37 = vld [vmem:[%s1963_s2] sm:$0xf] (!%p160_p10)  ;;  %s184_s4 = sand.u32 (!%p160_p10), 1, %s1530_s13   ;;  %s1370_s6 = sshll.u32 (!%p160_p10), %s1538_s15, 6  ;;  %vm1201_vm1 = vcmp.lt.s32.totalorder (!%p160_p10), %v256_v33, 512 }
  0x15   : > { %488 = vmatpush1.bf16.msra.mxu0 (!%p160_p10), %v1438_v7  ;;  %681 = vmatpush1.bf16.msra.mxu1 (!%p160_p10), %v1439_v8  ;;  %s1297_s5 = sshll.u32 (!%p160_p10), %s184_s4, 2  ;;  %s1914_s11 = scalar_lea.hbm (!%p160_p10), %s1964_s3, %s1370_s6 }
  0x16   : > { %s189_s7 = scalar_select %p188_p11, %s1538_s15, 1  ;;  %489 = vmatprep.subr.bf16.mxu0 %v1440_v9  ;;  %682 = vmatprep.subr.bf16.mxu1 %v1442_v10  ;;  %v258_v35 = vsub.s32 0, %v1762_v34  ;;  %v266_v36 = vsub.s32 2, %v1762_v34  ;;  %v262_v38 = vsub.s32 1, %v1762_v34  ;;  %v270_v39 = vsub.s32 3, %v1762_v34 }
  0x17   : > { %s186_s8 = scalar_lea.vmem [#allocation3], %s1297_s5  ;;  %s1205_s18 = scalar_lea.sflag [#allocation4], %s184_s4 }
  0x18   : > { %s1369_s28 = sshll.u32 %s189_s7, 7  ;;  %v1771_v40 = vrot.slane %v222_v37, %v258_v35  ;;  %v1773_v41 = vrot.slane %v222_v37, %v266_v36  ;;  %v1775_v42 = vrot.slane %v222_v37, %v262_v38  ;;  %v1777_v43 = vrot.slane %v222_v37, %v270_v39  ;;  %s1219_s9 = sshll.u32 %s186_s8, 4  ;;  %s1916_s9 = int_to_ptr.vmem [resolvable:$true] %s1219_s9 }
  0x19   : > { %s1675_s21 = scalar_lea.vmem %s1961_s0, %s1369_s28  ;;  %490 = vmatpush1.bf16.msra.mxu0 %v1444_v11  ;;  %683 = vmatpush1.bf16.msra.mxu1 %v1445_v12  ;;  %s1468_s19 = scalar_lea.vmem %s1916_s9, 64 }
  0x1a   : > { %491 = vmatprep.subr.bf16.mxu0 %v1446_v13  ;;  %684 = vmatprep.subr.bf16.mxu1 %v1448_v14  ;;  %v1452_v17 = vld [vmem:[%s1675_s21] sm:$0xff]   ;;  %v1453_v18 = vld [vmem:[%s1675_s21 + $0x8] sm:$0xff]   ;;  %v1454_v19 = vld [vmem:[%s1675_s21 + $0x10] sm:$0xff]   ;;  %p1469_p12 = scmp.ne.s32.totalorder %s1916_s9, %s1468_s19  ;;  %s1550_s15 = smov [#allocation3]  }
  0x1b   : > { %v1455_v20 = vld [vmem:[%s1675_s21 + $0x18] sm:$0xff]   ;;  %v1456_v21 = vld [vmem:[%s1675_s21 + $0x20] sm:$0xff]   ;;  %v1457_v22 = vld [vmem:[%s1675_s21 + $0x28] sm:$0xff]  }
  0x1c   : > { %v1458_v23 = vld [vmem:[%s1675_s21 + $0x30] sm:$0xff]   ;;  %v1459_v24 = vld [vmem:[%s1675_s21 + $0x38] sm:$0xff]   ;;  %v1460_v25 = vld [vmem:[%s1675_s21 + $0x40] sm:$0xff]   ;;  %p1470_p13 = pnand %p1469_p12, %p1611_p4 }
  0x1d   : > { %492 = vmatpush1.bf16.msra.mxu0 %v1450_v15  ;;  %685 = vmatpush1.bf16.msra.mxu1 %v1451_v16  ;;  %v1461_v26 = vld [vmem:[%s1675_s21 + $0x48] sm:$0xff]   ;;  %v1462_v27 = vld [vmem:[%s1675_s21 + $0x50] sm:$0xff]   ;;  %v1463_v28 = vld [vmem:[%s1675_s21 + $0x58] sm:$0xff]  }
  0x1e   : > { %v1464_v29 = vld [vmem:[%s1675_s21 + $0x60] sm:$0xff]   ;;  %v1465_v30 = vld [vmem:[%s1675_s21 + $0x68] sm:$0xff]   ;;  %v1466_v31 = vld [vmem:[%s1675_s21 + $0x70] sm:$0xff]   ;;  %p1471_p0 = pneg %p1470_p13 }
  0x1f   : > { %v1467_v32 = vld [vmem:[%s1675_s21 + $0x78] sm:$0xff]   ;;  %s1472_s21 = sshll.u32 %s1550_s15, 4  ;;  %s1473_s21 = int_to_ptr.vmem [resolvable:$false] %s1472_s21 }
  0x20   : > { %1332 = vmatmul.mubr.msk.bf16.vlgmr.msra.gmra.mrb[0].mxu0 %vm436_vm0, %v1452_v17  ;;  %1348 = vmatmul.mubr.msk.bf16.vlgmr.msra.gmra.mrb[0].mxu1 %vm436_vm0, %v1452_v17  ;;  %s1474_s23 = scalar_lea.vmem %s1473_s21, 128  ;;  %p1475_p1 = scmp.lt.s32.totalorder %s1916_s9, %s1473_s21 }
  0x21   : > { %527 = vmatprep.mubr.bf16.mxu0 %v1548_v2  ;;  %720 = vmatprep.mubr.bf16.mxu1 %v1548_v2  ;;  %p1476_p2 = scmp.lt.s32.totalorder %s1474_s23, %s1468_s19 }
  0x23   : > { %p1477_p3 = por %p1476_p2, %p1475_p1 }
  0x25   : > { %p1478_p5 = pnand %p1477_p3, %p1471_p0 }
  0x28   : > { %1333 = vmatmul.mubr.msk.bf16.gmra.mrb[4].mxu0 %vm436_vm0, %v1453_v18  ;;  %1349 = vmatmul.mubr.msk.bf16.gmra.mrb[4].mxu1 %vm436_vm0, %v1453_v18 }
  0x29   : > { %537 = vmatprep.mubr.bf16.mxu0 %v1548_v2  ;;  %730 = vmatprep.mubr.bf16.mxu1 %v1548_v2 }
  0x30   : > { %1334 = vmatmul.mubr.msk.bf16.gmra.mrb[8].mxu0 %vm436_vm0, %v1454_v19  ;;  %1350 = vmatmul.mubr.msk.bf16.gmra.mrb[8].mxu1 %vm436_vm0, %v1454_v19 }
  0x31   : > { %547 = vmatprep.mubr.bf16.mxu0 %v1548_v2  ;;  %740 = vmatprep.mubr.bf16.mxu1 %v1548_v2 }
  0x38   : > { %1335 = vmatmul.mubr.msk.bf16.gmra.mrb[12].mxu0 %vm436_vm0, %v1455_v20  ;;  %1351 = vmatmul.mubr.msk.bf16.gmra.mrb[12].mxu1 %vm436_vm0, %v1455_v20 }
  0x39   : > { %557 = vmatprep.mubr.bf16.mxu0 %v1548_v2  ;;  %750 = vmatprep.mubr.bf16.mxu1 %v1548_v2 }
  0x40   : > { %1336 = vmatmul.mubr.msk.bf16.gmra.mrb[16].mxu0 %vm436_vm0, %v1456_v21  ;;  %1352 = vmatmul.mubr.msk.bf16.gmra.mrb[16].mxu1 %vm436_vm0, %v1456_v21 }
  0x41   : > { %567 = vmatprep.mubr.bf16.mxu0 %v1548_v2  ;;  %760 = vmatprep.mubr.bf16.mxu1 %v1548_v2 }
  0x48   : > { %1337 = vmatmul.mubr.msk.bf16.gmra.mrb[20].mxu0 %vm436_vm0, %v1457_v22  ;;  %1353 = vmatmul.mubr.msk.bf16.gmra.mrb[20].mxu1 %vm436_vm0, %v1457_v22 }
  0x49   : > { %577 = vmatprep.mubr.bf16.mxu0 %v1548_v2  ;;  %770 = vmatprep.mubr.bf16.mxu1 %v1548_v2 }
  0x50   : > { %1338 = vmatmul.mubr.msk.bf16.gmra.mrb[24].mxu0 %vm436_vm0, %v1458_v23  ;;  %1354 = vmatmul.mubr.msk.bf16.gmra.mrb[24].mxu1 %vm436_vm0, %v1458_v23 }
  0x51   : > { %587 = vmatprep.mubr.bf16.mxu0 %v1548_v2  ;;  %780 = vmatprep.mubr.bf16.mxu1 %v1548_v2 }
  0x58   : > { %1339 = vmatmul.mubr.msk.bf16.gmra.mrb[28].mxu0 %vm436_vm0, %v1459_v24  ;;  %1355 = vmatmul.mubr.msk.bf16.gmra.mrb[28].mxu1 %vm436_vm0, %v1459_v24 }
  0x59   : > { %597 = vmatprep.mubr.bf16.mxu0 %v1548_v2  ;;  %790 = vmatprep.mubr.bf16.mxu1 %v1548_v2 }
  0x60   : > { %1340 = vmatmul.mubr.msk.bf16.gmra.mrb[32].mxu0 %vm436_vm0, %v1460_v25  ;;  %1356 = vmatmul.mubr.msk.bf16.gmra.mrb[32].mxu1 %vm436_vm0, %v1460_v25 }
  0x61   : > { %607 = vmatprep.mubr.bf16.mxu0 %v1548_v2  ;;  %800 = vmatprep.mubr.bf16.mxu1 %v1548_v2 }
  0x68   : > { %1341 = vmatmul.mubr.msk.bf16.gmra.mrb[36].mxu0 %vm436_vm0, %v1461_v26  ;;  %1357 = vmatmul.mubr.msk.bf16.gmra.mrb[36].mxu1 %vm436_vm0, %v1461_v26 }
  0x69   : > { %617 = vmatprep.mubr.bf16.mxu0 %v1548_v2  ;;  %810 = vmatprep.mubr.bf16.mxu1 %v1548_v2 }
  0x70   : > { %1342 = vmatmul.mubr.msk.bf16.gmra.mrb[40].mxu0 %vm436_vm0, %v1462_v27  ;;  %1358 = vmatmul.mubr.msk.bf16.gmra.mrb[40].mxu1 %vm436_vm0, %v1462_v27 }
  0x71   : > { %627 = vmatprep.mubr.bf16.mxu0 %v1548_v2  ;;  %820 = vmatprep.mubr.bf16.mxu1 %v1548_v2 }
  0x78   : > { %1343 = vmatmul.mubr.msk.bf16.gmra.mrb[44].mxu0 %vm436_vm0, %v1463_v28  ;;  %1359 = vmatmul.mubr.msk.bf16.gmra.mrb[44].mxu1 %vm436_vm0, %v1463_v28 }
  0x79   : > { %637 = vmatprep.mubr.bf16.mxu0 %v1548_v2  ;;  %830 = vmatprep.mubr.bf16.mxu1 %v1548_v2 }
  0x80   : > { %1344 = vmatmul.mubr.msk.bf16.gmra.mrb[48].mxu0 %vm436_vm0, %v1464_v29  ;;  %1360 = vmatmul.mubr.msk.bf16.gmra.mrb[48].mxu1 %vm436_vm0, %v1464_v29 }
  0x81   : > { %647 = vmatprep.mubr.bf16.mxu0 %v1548_v2  ;;  %840 = vmatprep.mubr.bf16.mxu1 %v1548_v2 }
  0x88   : > { %1345 = vmatmul.mubr.msk.bf16.gmra.mrb[52].mxu0 %vm436_vm0, %v1465_v30  ;;  %1361 = vmatmul.mubr.msk.bf16.gmra.mrb[52].mxu1 %vm436_vm0, %v1465_v30 }
  0x89   : > { %657 = vmatprep.mubr.bf16.mxu0 %v1548_v2  ;;  %850 = vmatprep.mubr.bf16.mxu1 %v1548_v2 }
  0x90   : > { %1346 = vmatmul.mubr.msk.bf16.gmra.mrb[56].mxu0 %vm436_vm0, %v1466_v31  ;;  %1362 = vmatmul.mubr.msk.bf16.gmra.mrb[56].mxu1 %vm436_vm0, %v1466_v31 }
  0x91   : > { %667 = vmatprep.mubr.bf16.mxu0 %v1548_v2  ;;  %860 = vmatprep.mubr.bf16.mxu1 %v1548_v2 }
  0x98   : > { %1347 = vmatmul.mubr.msk.bf16.gmra.mrb[60].mxu0 %vm436_vm0, %v1467_v32  ;;  %1363 = vmatmul.mubr.msk.bf16.gmra.mrb[60].mxu1 %vm436_vm0, %v1467_v32 }
  0xf3   : > { %v519_v44 = vpop.f32.mrb[0].mxu0  ;;  %v712_v45 = vpop.f32.mrb[0].mxu1 }
  0xf4   : > { %v520_v46 = vadd.f32 %v519_v44, %v1771_v40  ;;  %v713_v47 = vadd.f32 %v712_v45, %v1773_v41  ;;  %v521_v48 = vpop.f32.mrb[1].mxu0  ;;  %v714_v49 = vpop.f32.mrb[1].mxu1 }
  0xf5   : > { %v522_v50 = vadd.f32 %v521_v48, %v1775_v42  ;;  %v715_v51 = vadd.f32 %v714_v49, %v1777_v43  ;;  %v523_v52 = vpop.f32.mrb[2].mxu0  ;;  %v716_v53 = vpop.f32.mrb[2].mxu1 }
  0xf6   : > { %v524_v54 = vadd.f32 %v523_v52, %v1771_v40  ;;  %v717_v55 = vadd.f32 %v716_v53, %v1773_v41  ;;  %v525_v56 = vpop.f32.mrb[3].mxu0  ;;  %v718_v57 = vpop.f32.mrb[3].mxu1  ;;  %v871_v60 = vmax.f32 %v520_v46, 0.0  ;;  %v873_v61 = vmax.f32 %v713_v47, 0.0 }
  0xf7   : > { %v526_v58 = vadd.f32 %v525_v56, %v1775_v42  ;;  %v719_v59 = vadd.f32 %v718_v57, %v1777_v43  ;;  %v872_v0 = vmax.f32 %v522_v50, 0.0  ;;  %v874_v1 = vmax.f32 %v715_v51, 0.0 }
  0xf8   : > { %v875_v62 = vmax.f32 %v524_v54, 0.0  ;;  %v877_v63 = vmax.f32 %v717_v55, 0.0 }
  0xf9   : > { %v876_v2 = vmax.f32 %v526_v58, 0.0  ;;  %v878_v3 = vmax.f32 %v719_v59, 0.0 }
  0xfa   : > { %v1003_v4 = vadd.f32 %v875_v62, %v871_v60  ;;  %v1065_v5 = vadd.f32 %v877_v63, %v873_v61 }
  0xfb   : > { %v1034_v6 = vadd.f32 %v876_v2, %v872_v0  ;;  %v1096_v7 = vadd.f32 %v878_v3, %v874_v1  ;;  %v529_v8 = vpop.f32.mrb[4].mxu0  ;;  %v722_v9 = vpop.f32.mrb[4].mxu1 }
  0xfc   : > { %v530_v10 = vadd.f32 %v529_v8, %v1771_v40  ;;  %v723_v11 = vadd.f32 %v722_v9, %v1773_v41  ;;  %v531_v12 = vpop.f32.mrb[5].mxu0  ;;  %v724_v13 = vpop.f32.mrb[5].mxu1 }
  0xfd   : > { %v532_v14 = vadd.f32 %v531_v12, %v1775_v42  ;;  %v725_v15 = vadd.f32 %v724_v13, %v1777_v43  ;;  %v533_v16 = vpop.f32.mrb[6].mxu0  ;;  %v726_v17 = vpop.f32.mrb[6].mxu1 }
  0xfe   : > { %v879_v18 = vmax.f32 %v530_v10, 0.0  ;;  %v881_v19 = vmax.f32 %v723_v11, 0.0  ;;  %v534_v20 = vadd.f32 %v533_v16, %v1771_v40  ;;  %v727_v21 = vadd.f32 %v726_v17, %v1773_v41  ;;  %v535_v22 = vpop.f32.mrb[7].mxu0  ;;  %v728_v23 = vpop.f32.mrb[7].mxu1 }
  0xff   : > { %v880_v24 = vmax.f32 %v532_v14, 0.0  ;;  %v882_v25 = vmax.f32 %v725_v15, 0.0  ;;  %v536_v26 = vadd.f32 %v535_v22, %v1775_v42  ;;  %v729_v27 = vadd.f32 %v728_v23, %v1777_v43 }
 0x100   : > { %v1004_v28 = vadd.f32 %v1003_v4, %v879_v18  ;;  %v1066_v29 = vadd.f32 %v1065_v5, %v881_v19  ;;  %v883_v30 = vmax.f32 %v534_v20, 0.0  ;;  %v885_v31 = vmax.f32 %v727_v21, 0.0 }
 0x101   : > { %v1035_v32 = vadd.f32 %v1034_v6, %v880_v24  ;;  %v1097_v35 = vadd.f32 %v1096_v7, %v882_v25  ;;  %v884_v36 = vmax.f32 %v536_v26, 0.0  ;;  %v886_v37 = vmax.f32 %v729_v27, 0.0 }
 0x102   : > { %v1005_v38 = vadd.f32 %v1004_v28, %v883_v30  ;;  %v1067_v39 = vadd.f32 %v1066_v29, %v885_v31 }
 0x103   : > { %v1036_v44 = vadd.f32 %v1035_v32, %v884_v36  ;;  %v1098_v45 = vadd.f32 %v1097_v35, %v886_v37  ;;  %v539_v46 = vpop.f32.mrb[8].mxu0  ;;  %v732_v47 = vpop.f32.mrb[8].mxu1 }
 0x104   : > { %v540_v48 = vadd.f32 %v539_v46, %v1771_v40  ;;  %v733_v49 = vadd.f32 %v732_v47, %v1773_v41  ;;  %v541_v50 = vpop.f32.mrb[9].mxu0  ;;  %v734_v51 = vpop.f32.mrb[9].mxu1 }
 0x105   : > { %v542_v52 = vadd.f32 %v541_v50, %v1775_v42  ;;  %v735_v53 = vadd.f32 %v734_v51, %v1777_v43  ;;  %v543_v54 = vpop.f32.mrb[10].mxu0  ;;  %v736_v55 = vpop.f32.mrb[10].mxu1 }
 0x106   : > { %v887_v56 = vmax.f32 %v540_v48, 0.0  ;;  %v889_v57 = vmax.f32 %v733_v49, 0.0  ;;  %v544_v58 = vadd.f32 %v543_v54, %v1771_v40  ;;  %v737_v59 = vadd.f32 %v736_v55, %v1773_v41  ;;  %v545_v60 = vpop.f32.mrb[11].mxu0  ;;  %v738_v61 = vpop.f32.mrb[11].mxu1 }
 0x107   : > { %v888_v62 = vmax.f32 %v542_v52, 0.0  ;;  %v890_v63 = vmax.f32 %v735_v53, 0.0  ;;  %v546_v0 = vadd.f32 %v545_v60, %v1775_v42  ;;  %v739_v1 = vadd.f32 %v738_v61, %v1777_v43 }
 0x108   : > { %v1006_v2 = vadd.f32 %v1005_v38, %v887_v56  ;;  %v1068_v3 = vadd.f32 %v1067_v39, %v889_v57  ;;  %v891_v4 = vmax.f32 %v544_v58, 0.0  ;;  %v893_v5 = vmax.f32 %v737_v59, 0.0 }
 0x109   : > { %v1037_v6 = vadd.f32 %v1036_v44, %v888_v62  ;;  %v1099_v7 = vadd.f32 %v1098_v45, %v890_v63  ;;  %v892_v8 = vmax.f32 %v546_v0, 0.0  ;;  %v894_v9 = vmax.f32 %v739_v1, 0.0 }
 0x10a   : > { %v1007_v10 = vadd.f32 %v1006_v2, %v891_v4  ;;  %v1069_v11 = vadd.f32 %v1068_v3, %v893_v5 }
 0x10b   : > { %v1038_v12 = vadd.f32 %v1037_v6, %v892_v8  ;;  %v1100_v13 = vadd.f32 %v1099_v7, %v894_v9  ;;  %v549_v14 = vpop.f32.mrb[12].mxu0  ;;  %v742_v15 = vpop.f32.mrb[12].mxu1 }
 0x10c   : > { %v550_v16 = vadd.f32 %v549_v14, %v1771_v40  ;;  %v743_v17 = vadd.f32 %v742_v15, %v1773_v41  ;;  %v551_v18 = vpop.f32.mrb[13].mxu0  ;;  %v744_v19 = vpop.f32.mrb[13].mxu1 }
 0x10d   : > { %v552_v20 = vadd.f32 %v551_v18, %v1775_v42  ;;  %v745_v21 = vadd.f32 %v744_v19, %v1777_v43  ;;  %v553_v22 = vpop.f32.mrb[14].mxu0  ;;  %v746_v23 = vpop.f32.mrb[14].mxu1 }
 0x10e   : > { %v895_v24 = vmax.f32 %v550_v16, 0.0  ;;  %v897_v25 = vmax.f32 %v743_v17, 0.0  ;;  %v554_v26 = vadd.f32 %v553_v22, %v1771_v40  ;;  %v747_v27 = vadd.f32 %v746_v23, %v1773_v41  ;;  %v555_v28 = vpop.f32.mrb[15].mxu0  ;;  %v748_v29 = vpop.f32.mrb[15].mxu1 }
 0x10f   : > { %v896_v30 = vmax.f32 %v552_v20, 0.0  ;;  %v898_v31 = vmax.f32 %v745_v21, 0.0  ;;  %v556_v32 = vadd.f32 %v555_v28, %v1775_v42  ;;  %v749_v35 = vadd.f32 %v748_v29, %v1777_v43 }
 0x110   : > { %v1008_v36 = vadd.f32 %v1007_v10, %v895_v24  ;;  %v1070_v37 = vadd.f32 %v1069_v11, %v897_v25  ;;  %v899_v38 = vmax.f32 %v554_v26, 0.0  ;;  %v901_v39 = vmax.f32 %v747_v27, 0.0 }
 0x111   : > { %v1039_v44 = vadd.f32 %v1038_v12, %v896_v30  ;;  %v1101_v45 = vadd.f32 %v1100_v13, %v898_v31  ;;  %v900_v46 = vmax.f32 %v556_v32, 0.0  ;;  %v902_v47 = vmax.f32 %v749_v35, 0.0 }
 0x112   : > { %v1009_v48 = vadd.f32 %v1008_v36, %v899_v38  ;;  %v1071_v49 = vadd.f32 %v1070_v37, %v901_v39 }
 0x113   : > { %v1040_v50 = vadd.f32 %v1039_v44, %v900_v46  ;;  %v1102_v51 = vadd.f32 %v1101_v45, %v902_v47  ;;  %v559_v52 = vpop.f32.mrb[16].mxu0  ;;  %v752_v53 = vpop.f32.mrb[16].mxu1 }
 0x114   : > { %v560_v54 = vadd.f32 %v559_v52, %v1771_v40  ;;  %v753_v55 = vadd.f32 %v752_v53, %v1773_v41  ;;  %v561_v56 = vpop.f32.mrb[17].mxu0  ;;  %v754_v57 = vpop.f32.mrb[17].mxu1 }
 0x115   : > { %v562_v58 = vadd.f32 %v561_v56, %v1775_v42  ;;  %v755_v59 = vadd.f32 %v754_v57, %v1777_v43  ;;  %v563_v60 = vpop.f32.mrb[18].mxu0  ;;  %v756_v61 = vpop.f32.mrb[18].mxu1 }
 0x116   : > { %v903_v62 = vmax.f32 %v560_v54, 0.0  ;;  %v905_v63 = vmax.f32 %v753_v55, 0.0  ;;  %v564_v0 = vadd.f32 %v563_v60, %v1771_v40  ;;  %v757_v1 = vadd.f32 %v756_v61, %v1773_v41  ;;  %v565_v2 = vpop.f32.mrb[19].mxu0  ;;  %v758_v3 = vpop.f32.mrb[19].mxu1 }
 0x117   : > { %v904_v4 = vmax.f32 %v562_v58, 0.0  ;;  %v906_v5 = vmax.f32 %v755_v59, 0.0  ;;  %v566_v6 = vadd.f32 %v565_v2, %v1775_v42  ;;  %v759_v7 = vadd.f32 %v758_v3, %v1777_v43 }
 0x118   : > { %v1010_v8 = vadd.f32 %v1009_v48, %v903_v62  ;;  %v1072_v9 = vadd.f32 %v1071_v49, %v905_v63  ;;  %v907_v10 = vmax.f32 %v564_v0, 0.0  ;;  %v909_v11 = vmax.f32 %v757_v1, 0.0 }
 0x119   : > { %v1041_v12 = vadd.f32 %v1040_v50, %v904_v4  ;;  %v1103_v13 = vadd.f32 %v1102_v51, %v906_v5  ;;  %v908_v14 = vmax.f32 %v566_v6, 0.0  ;;  %v910_v15 = vmax.f32 %v759_v7, 0.0 }
 0x11a   : > { %v1011_v16 = vadd.f32 %v1010_v8, %v907_v10  ;;  %v1073_v17 = vadd.f32 %v1072_v9, %v909_v11 }
 0x11b   : > { %v1042_v18 = vadd.f32 %v1041_v12, %v908_v14  ;;  %v1104_v19 = vadd.f32 %v1103_v13, %v910_v15  ;;  %v569_v20 = vpop.f32.mrb[20].mxu0  ;;  %v762_v21 = vpop.f32.mrb[20].mxu1 }
 0x11c   : > { %v570_v22 = vadd.f32 %v569_v20, %v1771_v40  ;;  %v763_v23 = vadd.f32 %v762_v21, %v1773_v41  ;;  %v571_v24 = vpop.f32.mrb[21].mxu0  ;;  %v764_v25 = vpop.f32.mrb[21].mxu1 }
 0x11d   : > { %v572_v26 = vadd.f32 %v571_v24, %v1775_v42  ;;  %v765_v27 = vadd.f32 %v764_v25, %v1777_v43  ;;  %v573_v28 = vpop.f32.mrb[22].mxu0  ;;  %v766_v29 = vpop.f32.mrb[22].mxu1 }
 0x11e   : > { %v911_v30 = vmax.f32 %v570_v22, 0.0  ;;  %v913_v31 = vmax.f32 %v763_v23, 0.0  ;;  %v574_v32 = vadd.f32 %v573_v28, %v1771_v40  ;;  %v767_v35 = vadd.f32 %v766_v29, %v1773_v41  ;;  %v575_v36 = vpop.f32.mrb[23].mxu0  ;;  %v768_v37 = vpop.f32.mrb[23].mxu1 }
 0x11f   : > { %v912_v38 = vmax.f32 %v572_v26, 0.0  ;;  %v914_v39 = vmax.f32 %v765_v27, 0.0  ;;  %v576_v44 = vadd.f32 %v575_v36, %v1775_v42  ;;  %v769_v45 = vadd.f32 %v768_v37, %v1777_v43 }
 0x120   : > { %v1012_v46 = vadd.f32 %v1011_v16, %v911_v30  ;;  %v1074_v47 = vadd.f32 %v1073_v17, %v913_v31  ;;  %v915_v48 = vmax.f32 %v574_v32, 0.0  ;;  %v917_v49 = vmax.f32 %v767_v35, 0.0 }
 0x121   : > { %v1043_v50 = vadd.f32 %v1042_v18, %v912_v38  ;;  %v1105_v51 = vadd.f32 %v1104_v19, %v914_v39  ;;  %v916_v52 = vmax.f32 %v576_v44, 0.0  ;;  %v918_v53 = vmax.f32 %v769_v45, 0.0 }
 0x122   : > { %v1013_v54 = vadd.f32 %v1012_v46, %v915_v48  ;;  %v1075_v55 = vadd.f32 %v1074_v47, %v917_v49 }
 0x123   : > { %v1044_v56 = vadd.f32 %v1043_v50, %v916_v52  ;;  %v1106_v57 = vadd.f32 %v1105_v51, %v918_v53  ;;  %v579_v58 = vpop.f32.mrb[24].mxu0  ;;  %v772_v59 = vpop.f32.mrb[24].mxu1 }
 0x124   : > { %v580_v60 = vadd.f32 %v579_v58, %v1771_v40  ;;  %v773_v61 = vadd.f32 %v772_v59, %v1773_v41  ;;  %v581_v62 = vpop.f32.mrb[25].mxu0  ;;  %v774_v63 = vpop.f32.mrb[25].mxu1 }
 0x125   : > { %v582_v0 = vadd.f32 %v581_v62, %v1775_v42  ;;  %v775_v1 = vadd.f32 %v774_v63, %v1777_v43  ;;  %v583_v2 = vpop.f32.mrb[26].mxu0  ;;  %v776_v3 = vpop.f32.mrb[26].mxu1 }
 0x126   : > { %v919_v4 = vmax.f32 %v580_v60, 0.0  ;;  %v921_v5 = vmax.f32 %v773_v61, 0.0  ;;  %v584_v6 = vadd.f32 %v583_v2, %v1771_v40  ;;  %v777_v7 = vadd.f32 %v776_v3, %v1773_v41  ;;  %v585_v8 = vpop.f32.mrb[27].mxu0  ;;  %v778_v9 = vpop.f32.mrb[27].mxu1 }
 0x127   : > { %v920_v10 = vmax.f32 %v582_v0, 0.0  ;;  %v922_v11 = vmax.f32 %v775_v1, 0.0  ;;  %v586_v12 = vadd.f32 %v585_v8, %v1775_v42  ;;  %v779_v13 = vadd.f32 %v778_v9, %v1777_v43 }
 0x128   : > { %v1014_v14 = vadd.f32 %v1013_v54, %v919_v4  ;;  %v1076_v15 = vadd.f32 %v1075_v55, %v921_v5  ;;  %v923_v16 = vmax.f32 %v584_v6, 0.0  ;;  %v925_v17 = vmax.f32 %v777_v7, 0.0 }
 0x129   : > { %v1045_v18 = vadd.f32 %v1044_v56, %v920_v10  ;;  %v1107_v19 = vadd.f32 %v1106_v57, %v922_v11  ;;  %v924_v20 = vmax.f32 %v586_v12, 0.0  ;;  %v926_v21 = vmax.f32 %v779_v13, 0.0 }
 0x12a   : > { %v1015_v22 = vadd.f32 %v1014_v14, %v923_v16  ;;  %v1077_v23 = vadd.f32 %v1076_v15, %v925_v17 }
 0x12b   : > { %v1046_v24 = vadd.f32 %v1045_v18, %v924_v20  ;;  %v1108_v25 = vadd.f32 %v1107_v19, %v926_v21  ;;  %v589_v26 = vpop.f32.mrb[28].mxu0  ;;  %v782_v27 = vpop.f32.mrb[28].mxu1 }
 0x12c   : > { %v590_v28 = vadd.f32 %v589_v26, %v1771_v40  ;;  %v783_v29 = vadd.f32 %v782_v27, %v1773_v41  ;;  %v591_v30 = vpop.f32.mrb[29].mxu0  ;;  %v784_v31 = vpop.f32.mrb[29].mxu1 }
 0x12d   : > { %v592_v32 = vadd.f32 %v591_v30, %v1775_v42  ;;  %v785_v35 = vadd.f32 %v784_v31, %v1777_v43  ;;  %v593_v36 = vpop.f32.mrb[30].mxu0  ;;  %v786_v37 = vpop.f32.mrb[30].mxu1 }
 0x12e   : > { %v927_v38 = vmax.f32 %v590_v28, 0.0  ;;  %v929_v39 = vmax.f32 %v783_v29, 0.0  ;;  %v594_v44 = vadd.f32 %v593_v36, %v1771_v40  ;;  %v787_v45 = vadd.f32 %v786_v37, %v1773_v41  ;;  %v595_v46 = vpop.f32.mrb[31].mxu0  ;;  %v788_v47 = vpop.f32.mrb[31].mxu1 }
 0x12f   : > { %v928_v48 = vmax.f32 %v592_v32, 0.0  ;;  %v930_v49 = vmax.f32 %v785_v35, 0.0  ;;  %v596_v50 = vadd.f32 %v595_v46, %v1775_v42  ;;  %v789_v51 = vadd.f32 %v788_v47, %v1777_v43 }
 0x130   : > { %v1016_v52 = vadd.f32 %v1015_v22, %v927_v38  ;;  %v1078_v53 = vadd.f32 %v1077_v23, %v929_v39  ;;  %v931_v54 = vmax.f32 %v594_v44, 0.0  ;;  %v933_v55 = vmax.f32 %v787_v45, 0.0 }
 0x131   : > { %v1047_v56 = vadd.f32 %v1046_v24, %v928_v48  ;;  %v1109_v57 = vadd.f32 %v1108_v25, %v930_v49  ;;  %v932_v58 = vmax.f32 %v596_v50, 0.0  ;;  %v934_v59 = vmax.f32 %v789_v51, 0.0 }
 0x132   : > { %v1017_v60 = vadd.f32 %v1016_v52, %v931_v54  ;;  %v1079_v61 = vadd.f32 %v1078_v53, %v933_v55 }
 0x133   : > { %v1048_v62 = vadd.f32 %v1047_v56, %v932_v58  ;;  %v1110_v63 = vadd.f32 %v1109_v57, %v934_v59  ;;  %v599_v0 = vpop.f32.mrb[32].mxu0  ;;  %v792_v1 = vpop.f32.mrb[32].mxu1 }
 0x134   : > { %v600_v2 = vadd.f32 %v599_v0, %v1771_v40  ;;  %v793_v3 = vadd.f32 %v792_v1, %v1773_v41  ;;  %v601_v4 = vpop.f32.mrb[33].mxu0  ;;  %v794_v5 = vpop.f32.mrb[33].mxu1 }
 0x135   : > { %v602_v6 = vadd.f32 %v601_v4, %v1775_v42  ;;  %v795_v7 = vadd.f32 %v794_v5, %v1777_v43  ;;  %v603_v8 = vpop.f32.mrb[34].mxu0  ;;  %v796_v9 = vpop.f32.mrb[34].mxu1 }
 0x136   : > { %v935_v10 = vmax.f32 %v600_v2, 0.0  ;;  %v937_v11 = vmax.f32 %v793_v3, 0.0  ;;  %v604_v12 = vadd.f32 %v603_v8, %v1771_v40  ;;  %v797_v13 = vadd.f32 %v796_v9, %v1773_v41  ;;  %v605_v14 = vpop.f32.mrb[35].mxu0  ;;  %v798_v15 = vpop.f32.mrb[35].mxu1 }
 0x137   : > { %v936_v16 = vmax.f32 %v602_v6, 0.0  ;;  %v938_v17 = vmax.f32 %v795_v7, 0.0  ;;  %v606_v18 = vadd.f32 %v605_v14, %v1775_v42  ;;  %v799_v19 = vadd.f32 %v798_v15, %v1777_v43 }
 0x138   : > { %v1018_v20 = vadd.f32 %v1017_v60, %v935_v10  ;;  %v1080_v21 = vadd.f32 %v1079_v61, %v937_v11  ;;  %v939_v22 = vmax.f32 %v604_v12, 0.0  ;;  %v941_v23 = vmax.f32 %v797_v13, 0.0 }
 0x139   : > { %v1049_v24 = vadd.f32 %v1048_v62, %v936_v16  ;;  %v1111_v25 = vadd.f32 %v1110_v63, %v938_v17  ;;  %v940_v26 = vmax.f32 %v606_v18, 0.0  ;;  %v942_v27 = vmax.f32 %v799_v19, 0.0 }
 0x13a   : > { %v1019_v28 = vadd.f32 %v1018_v20, %v939_v22  ;;  %v1081_v29 = vadd.f32 %v1080_v21, %v941_v23 }
 0x13b   : > { %v1050_v30 = vadd.f32 %v1049_v24, %v940_v26  ;;  %v1112_v31 = vadd.f32 %v1111_v25, %v942_v27  ;;  %v609_v32 = vpop.f32.mrb[36].mxu0  ;;  %v802_v35 = vpop.f32.mrb[36].mxu1 }
 0x13c   : > { %v610_v36 = vadd.f32 %v609_v32, %v1771_v40  ;;  %v803_v37 = vadd.f32 %v802_v35, %v1773_v41  ;;  %v611_v38 = vpop.f32.mrb[37].mxu0  ;;  %v804_v39 = vpop.f32.mrb[37].mxu1 }
 0x13d   : > { %v612_v44 = vadd.f32 %v611_v38, %v1775_v42  ;;  %v805_v45 = vadd.f32 %v804_v39, %v1777_v43  ;;  %v613_v46 = vpop.f32.mrb[38].mxu0  ;;  %v806_v47 = vpop.f32.mrb[38].mxu1 }
 0x13e   : > { %v943_v48 = vmax.f32 %v610_v36, 0.0  ;;  %v945_v49 = vmax.f32 %v803_v37, 0.0  ;;  %v614_v50 = vadd.f32 %v613_v46, %v1771_v40  ;;  %v807_v51 = vadd.f32 %v806_v47, %v1773_v41  ;;  %v615_v52 = vpop.f32.mrb[39].mxu0  ;;  %v808_v53 = vpop.f32.mrb[39].mxu1 }
 0x13f   : > { %v944_v54 = vmax.f32 %v612_v44, 0.0  ;;  %v946_v55 = vmax.f32 %v805_v45, 0.0  ;;  %v616_v56 = vadd.f32 %v615_v52, %v1775_v42  ;;  %v809_v57 = vadd.f32 %v808_v53, %v1777_v43 }
 0x140   : > { %v1020_v58 = vadd.f32 %v1019_v28, %v943_v48  ;;  %v1082_v59 = vadd.f32 %v1081_v29, %v945_v49  ;;  %v947_v60 = vmax.f32 %v614_v50, 0.0  ;;  %v949_v61 = vmax.f32 %v807_v51, 0.0 }
 0x141   : > { %v1051_v62 = vadd.f32 %v1050_v30, %v944_v54  ;;  %v1113_v63 = vadd.f32 %v1112_v31, %v946_v55  ;;  %v948_v0 = vmax.f32 %v616_v56, 0.0  ;;  %v950_v1 = vmax.f32 %v809_v57, 0.0 }
 0x142   : > { %v1021_v2 = vadd.f32 %v1020_v58, %v947_v60  ;;  %v1083_v3 = vadd.f32 %v1082_v59, %v949_v61 }
 0x143   : > { %v1052_v4 = vadd.f32 %v1051_v62, %v948_v0  ;;  %v1114_v5 = vadd.f32 %v1113_v63, %v950_v1  ;;  %v619_v6 = vpop.f32.mrb[40].mxu0  ;;  %v812_v7 = vpop.f32.mrb[40].mxu1 }
 0x144   : > { %v620_v8 = vadd.f32 %v619_v6, %v1771_v40  ;;  %v813_v9 = vadd.f32 %v812_v7, %v1773_v41  ;;  %v621_v10 = vpop.f32.mrb[41].mxu0  ;;  %v814_v11 = vpop.f32.mrb[41].mxu1 }
 0x145   : > { %v622_v12 = vadd.f32 %v621_v10, %v1775_v42  ;;  %v815_v13 = vadd.f32 %v814_v11, %v1777_v43  ;;  %v623_v14 = vpop.f32.mrb[42].mxu0  ;;  %v816_v15 = vpop.f32.mrb[42].mxu1 }
 0x146   : > { %v951_v16 = vmax.f32 %v620_v8, 0.0  ;;  %v953_v17 = vmax.f32 %v813_v9, 0.0  ;;  %v624_v18 = vadd.f32 %v623_v14, %v1771_v40  ;;  %v817_v19 = vadd.f32 %v816_v15, %v1773_v41  ;;  %v625_v20 = vpop.f32.mrb[43].mxu0  ;;  %v818_v21 = vpop.f32.mrb[43].mxu1 }
 0x147   : > { %v952_v22 = vmax.f32 %v622_v12, 0.0  ;;  %v954_v23 = vmax.f32 %v815_v13, 0.0  ;;  %v626_v24 = vadd.f32 %v625_v20, %v1775_v42  ;;  %v819_v25 = vadd.f32 %v818_v21, %v1777_v43 }
 0x148   : > { %v1022_v26 = vadd.f32 %v1021_v2, %v951_v16  ;;  %v1084_v27 = vadd.f32 %v1083_v3, %v953_v17  ;;  %v955_v28 = vmax.f32 %v624_v18, 0.0  ;;  %v957_v29 = vmax.f32 %v817_v19, 0.0 }
 0x149   : > { %v1053_v30 = vadd.f32 %v1052_v4, %v952_v22  ;;  %v1115_v31 = vadd.f32 %v1114_v5, %v954_v23  ;;  %v956_v32 = vmax.f32 %v626_v24, 0.0  ;;  %v958_v35 = vmax.f32 %v819_v25, 0.0 }
 0x14a   : > { %v1023_v36 = vadd.f32 %v1022_v26, %v955_v28  ;;  %v1085_v37 = vadd.f32 %v1084_v27, %v957_v29 }
 0x14b   : > { %v1054_v38 = vadd.f32 %v1053_v30, %v956_v32  ;;  %v1116_v39 = vadd.f32 %v1115_v31, %v958_v35  ;;  %v629_v44 = vpop.f32.mrb[44].mxu0  ;;  %v822_v45 = vpop.f32.mrb[44].mxu1 }
 0x14c   : > { %v630_v46 = vadd.f32 %v629_v44, %v1771_v40  ;;  %v823_v47 = vadd.f32 %v822_v45, %v1773_v41  ;;  %v631_v48 = vpop.f32.mrb[45].mxu0  ;;  %v824_v49 = vpop.f32.mrb[45].mxu1 }
 0x14d   : > { %v632_v50 = vadd.f32 %v631_v48, %v1775_v42  ;;  %v825_v51 = vadd.f32 %v824_v49, %v1777_v43  ;;  %v633_v52 = vpop.f32.mrb[46].mxu0  ;;  %v826_v53 = vpop.f32.mrb[46].mxu1 }
 0x14e   : > { %v959_v54 = vmax.f32 %v630_v46, 0.0  ;;  %v961_v55 = vmax.f32 %v823_v47, 0.0  ;;  %v634_v56 = vadd.f32 %v633_v52, %v1771_v40  ;;  %v827_v57 = vadd.f32 %v826_v53, %v1773_v41  ;;  %v635_v58 = vpop.f32.mrb[47].mxu0  ;;  %v828_v59 = vpop.f32.mrb[47].mxu1 }
 0x14f   : > { %v960_v60 = vmax.f32 %v632_v50, 0.0  ;;  %v962_v61 = vmax.f32 %v825_v51, 0.0  ;;  %v636_v62 = vadd.f32 %v635_v58, %v1775_v42  ;;  %v829_v63 = vadd.f32 %v828_v59, %v1777_v43 }
 0x150   : > { %v1024_v0 = vadd.f32 %v1023_v36, %v959_v54  ;;  %v1086_v1 = vadd.f32 %v1085_v37, %v961_v55  ;;  %v963_v2 = vmax.f32 %v634_v56, 0.0  ;;  %v965_v3 = vmax.f32 %v827_v57, 0.0 }
 0x151   : > { %v1055_v4 = vadd.f32 %v1054_v38, %v960_v60  ;;  %v1117_v5 = vadd.f32 %v1116_v39, %v962_v61  ;;  %v964_v6 = vmax.f32 %v636_v62, 0.0  ;;  %v966_v7 = vmax.f32 %v829_v63, 0.0 }
 0x152   : > { %v1025_v8 = vadd.f32 %v1024_v0, %v963_v2  ;;  %v1087_v9 = vadd.f32 %v1086_v1, %v965_v3 }
 0x153   : > { %v1056_v10 = vadd.f32 %v1055_v4, %v964_v6  ;;  %v1118_v11 = vadd.f32 %v1117_v5, %v966_v7  ;;  %v639_v12 = vpop.f32.mrb[48].mxu0  ;;  %v832_v13 = vpop.f32.mrb[48].mxu1 }
 0x154   : > { %v640_v14 = vadd.f32 %v639_v12, %v1771_v40  ;;  %v833_v15 = vadd.f32 %v832_v13, %v1773_v41  ;;  %v641_v16 = vpop.f32.mrb[49].mxu0  ;;  %v834_v17 = vpop.f32.mrb[49].mxu1 }
 0x155   : > { %v642_v18 = vadd.f32 %v641_v16, %v1775_v42  ;;  %v835_v19 = vadd.f32 %v834_v17, %v1777_v43  ;;  %v643_v20 = vpop.f32.mrb[50].mxu0  ;;  %v836_v21 = vpop.f32.mrb[50].mxu1 }
 0x156   : > { %v967_v22 = vmax.f32 %v640_v14, 0.0  ;;  %v969_v23 = vmax.f32 %v833_v15, 0.0  ;;  %v644_v24 = vadd.f32 %v643_v20, %v1771_v40  ;;  %v837_v25 = vadd.f32 %v836_v21, %v1773_v41  ;;  %v645_v26 = vpop.f32.mrb[51].mxu0  ;;  %v838_v27 = vpop.f32.mrb[51].mxu1 }
 0x157   : > { %v968_v28 = vmax.f32 %v642_v18, 0.0  ;;  %v970_v29 = vmax.f32 %v835_v19, 0.0  ;;  %v646_v30 = vadd.f32 %v645_v26, %v1775_v42  ;;  %v839_v31 = vadd.f32 %v838_v27, %v1777_v43 }
 0x158   : > { %v1026_v32 = vadd.f32 %v1025_v8, %v967_v22  ;;  %v1088_v35 = vadd.f32 %v1087_v9, %v969_v23  ;;  %v971_v36 = vmax.f32 %v644_v24, 0.0  ;;  %v973_v37 = vmax.f32 %v837_v25, 0.0 }
 0x159   : > { %v1057_v38 = vadd.f32 %v1056_v10, %v968_v28  ;;  %v1119_v39 = vadd.f32 %v1118_v11, %v970_v29  ;;  %v972_v44 = vmax.f32 %v646_v30, 0.0  ;;  %v974_v45 = vmax.f32 %v839_v31, 0.0 }
 0x15a   : > { %v1027_v46 = vadd.f32 %v1026_v32, %v971_v36  ;;  %v1089_v47 = vadd.f32 %v1088_v35, %v973_v37 }
 0x15b   : > { %v1058_v48 = vadd.f32 %v1057_v38, %v972_v44  ;;  %v1120_v49 = vadd.f32 %v1119_v39, %v974_v45  ;;  %v649_v50 = vpop.f32.mrb[52].mxu0  ;;  %v842_v51 = vpop.f32.mrb[52].mxu1 }
 0x15c   : > { %v650_v52 = vadd.f32 %v649_v50, %v1771_v40  ;;  %v843_v53 = vadd.f32 %v842_v51, %v1773_v41  ;;  %v651_v54 = vpop.f32.mrb[53].mxu0  ;;  %v844_v55 = vpop.f32.mrb[53].mxu1 }
 0x15d   : > { %v652_v56 = vadd.f32 %v651_v54, %v1775_v42  ;;  %v845_v57 = vadd.f32 %v844_v55, %v1777_v43  ;;  %v653_v58 = vpop.f32.mrb[54].mxu0  ;;  %v846_v59 = vpop.f32.mrb[54].mxu1 }
 0x15e   : > { %v975_v60 = vmax.f32 %v650_v52, 0.0  ;;  %v977_v61 = vmax.f32 %v843_v53, 0.0  ;;  %v654_v62 = vadd.f32 %v653_v58, %v1771_v40  ;;  %v847_v63 = vadd.f32 %v846_v59, %v1773_v41  ;;  %v655_v0 = vpop.f32.mrb[55].mxu0  ;;  %v848_v1 = vpop.f32.mrb[55].mxu1 }
 0x15f   : > { %v976_v2 = vmax.f32 %v652_v56, 0.0  ;;  %v978_v3 = vmax.f32 %v845_v57, 0.0  ;;  %v656_v4 = vadd.f32 %v655_v0, %v1775_v42  ;;  %v849_v5 = vadd.f32 %v848_v1, %v1777_v43 }
 0x160   : > { %v1028_v6 = vadd.f32 %v1027_v46, %v975_v60  ;;  %v1090_v7 = vadd.f32 %v1089_v47, %v977_v61  ;;  %v979_v8 = vmax.f32 %v654_v62, 0.0  ;;  %v981_v9 = vmax.f32 %v847_v63, 0.0 }
 0x161   : > { %v1059_v10 = vadd.f32 %v1058_v48, %v976_v2  ;;  %v1121_v11 = vadd.f32 %v1120_v49, %v978_v3  ;;  %v980_v12 = vmax.f32 %v656_v4, 0.0  ;;  %v982_v13 = vmax.f32 %v849_v5, 0.0 }
 0x162   : > { %v1029_v14 = vadd.f32 %v1028_v6, %v979_v8  ;;  %v1091_v15 = vadd.f32 %v1090_v7, %v981_v9 }
 0x163   : > { %v1060_v16 = vadd.f32 %v1059_v10, %v980_v12  ;;  %v1122_v17 = vadd.f32 %v1121_v11, %v982_v13  ;;  %v659_v18 = vpop.f32.mrb[56].mxu0  ;;  %v852_v19 = vpop.f32.mrb[56].mxu1 }
 0x164   : > { %v660_v20 = vadd.f32 %v659_v18, %v1771_v40  ;;  %v853_v21 = vadd.f32 %v852_v19, %v1773_v41  ;;  %v661_v22 = vpop.f32.mrb[57].mxu0  ;;  %v854_v23 = vpop.f32.mrb[57].mxu1 }
 0x165   : > { %v662_v24 = vadd.f32 %v661_v22, %v1775_v42  ;;  %v855_v25 = vadd.f32 %v854_v23, %v1777_v43  ;;  %v663_v26 = vpop.f32.mrb[58].mxu0  ;;  %v856_v27 = vpop.f32.mrb[58].mxu1 }
 0x166   : > { %v983_v28 = vmax.f32 %v660_v20, 0.0  ;;  %v985_v29 = vmax.f32 %v853_v21, 0.0  ;;  %v664_v30 = vadd.f32 %v663_v26, %v1771_v40  ;;  %v857_v31 = vadd.f32 %v856_v27, %v1773_v41  ;;  %v665_v32 = vpop.f32.mrb[59].mxu0  ;;  %v858_v35 = vpop.f32.mrb[59].mxu1 }
 0x167   : > { %v984_v36 = vmax.f32 %v662_v24, 0.0  ;;  %v986_v37 = vmax.f32 %v855_v25, 0.0  ;;  %v666_v38 = vadd.f32 %v665_v32, %v1775_v42  ;;  %v859_v39 = vadd.f32 %v858_v35, %v1777_v43 }
 0x168   : > { %v1030_v44 = vadd.f32 %v1029_v14, %v983_v28  ;;  %v1092_v45 = vadd.f32 %v1091_v15, %v985_v29  ;;  %v987_v46 = vmax.f32 %v664_v30, 0.0  ;;  %v989_v47 = vmax.f32 %v857_v31, 0.0 }
 0x169   : > { %v1061_v48 = vadd.f32 %v1060_v16, %v984_v36  ;;  %v1123_v49 = vadd.f32 %v1122_v17, %v986_v37  ;;  %v988_v50 = vmax.f32 %v666_v38, 0.0  ;;  %v990_v51 = vmax.f32 %v859_v39, 0.0 }
 0x16a   : > { %v1031_v52 = vadd.f32 %v1030_v44, %v987_v46  ;;  %v1093_v53 = vadd.f32 %v1092_v45, %v989_v47  ;;  %v1549_v32 = vmov 1966171168  }
 0x16b   : > { %v1062_v54 = vadd.f32 %v1061_v48, %v988_v50  ;;  %v1124_v55 = vadd.f32 %v1123_v49, %v990_v51  ;;  %v669_v56 = vpop.f32.mrb[60].mxu0  ;;  %v862_v57 = vpop.f32.mrb[60].mxu1  ;;  %v1177_v35 = vunpack.c.l.s4 %v1549_v32 }
 0x16c   : > { %v670_v58 = vadd.f32 %v669_v56, %v1771_v40  ;;  %v863_v59 = vadd.f32 %v862_v57, %v1773_v41  ;;  %v671_v60 = vpop.f32.mrb[61].mxu0  ;;  %v864_v61 = vpop.f32.mrb[61].mxu1 }
 0x16d   : > { %v672_v62 = vadd.f32 %v671_v60, %v1775_v42  ;;  %v865_v63 = vadd.f32 %v864_v61, %v1777_v43  ;;  %v673_v0 = vpop.f32.mrb[62].mxu0  ;;  %v866_v1 = vpop.f32.mrb[62].mxu1  ;;  %v1178_v48 = vunpack.c.0.s8 %v1177_v35 }
 0x16e   : > { %v991_v2 = vmax.f32 %v670_v58, 0.0  ;;  %v993_v3 = vmax.f32 %v863_v59, 0.0  ;;  %v674_v4 = vadd.f32 %v673_v0, %v1771_v40  ;;  %v867_v5 = vadd.f32 %v866_v1, %v1773_v41  ;;  %v675_v6 = vpop.f32.mrb[63].mxu0  ;;  %v868_v7 = vpop.f32.mrb[63].mxu1 }
 0x16f   : > { %v992_v8 = vmax.f32 %v672_v62, 0.0  ;;  %v994_v9 = vmax.f32 %v865_v63, 0.0  ;;  %v676_v10 = vadd.f32 %v675_v6, %v1775_v42  ;;  %v869_v11 = vadd.f32 %v868_v7, %v1777_v43 }
 0x170   : > { %v1032_v12 = vadd.f32 %v1031_v52, %v991_v2  ;;  %v1094_v13 = vadd.f32 %v1093_v53, %v993_v3  ;;  %v995_v14 = vmax.f32 %v674_v4, 0.0  ;;  %v997_v15 = vmax.f32 %v867_v5, 0.0 }
 0x171   : > { %v1063_v16 = vadd.f32 %v1062_v54, %v992_v8  ;;  %v1125_v17 = vadd.f32 %v1124_v55, %v994_v9  ;;  %v996_v18 = vmax.f32 %v676_v10, 0.0  ;;  %v998_v19 = vmax.f32 %v869_v11, 0.0 }
 0x172   : > { %v1033_v20 = vadd.f32 %v1032_v12, %v995_v14  ;;  %v1095_v40 = vadd.f32 %v1094_v13, %v997_v15  ;;  %v1181_v57 = vsub.s32 %v1178_v48, %v1762_v34 }
 0x173   : > { %v1064_v21 = vadd.f32 %v1063_v16, %v996_v18  ;;  %v1126_v41 = vadd.f32 %v1125_v17, %v998_v19 }
 0x174   : > { %v1142_v22 = vrot.slane %v1033_v20, 4  ;;  %v1154_v23 = vrot.slane %v1095_v40, 4 }
 0x175   : > { %v1148_v24 = vrot.slane %v1064_v21, 4  ;;  %v1160_v25 = vrot.slane %v1126_v41, 4 }
 0x176   : > { %v1143_v26 = vadd.f32 %v1142_v22, %v1033_v20  ;;  %v1155_v42 = vadd.f32 %v1154_v23, %v1095_v40 }
 0x177   : > { %v1149_v27 = vadd.f32 %v1148_v24, %v1064_v21  ;;  %v1161_v43 = vadd.f32 %v1160_v25, %v1126_v41 }
 0x178   : > { %v1144_v28 = vrot.slane %v1143_v26, 2  ;;  %v1156_v29 = vrot.slane %v1155_v42, 2 }
 0x179   : > { %v1150_v30 = vrot.slane %v1149_v27, 2  ;;  %v1162_v31 = vrot.slane %v1161_v43, 2 }
 0x17a   : > { %v1145_v36 = vadd.f32 %v1144_v28, %v1143_v26  ;;  %v1157_v37 = vadd.f32 %v1156_v29, %v1155_v42 }
 0x17b   : > { %v1151_v38 = vadd.f32 %v1150_v30, %v1149_v27  ;;  %v1163_v39 = vadd.f32 %v1162_v31, %v1161_v43 }
 0x17c   : > { %v1146_v44 = vrot.slane %v1145_v36, 1  ;;  %v1158_v45 = vrot.slane %v1157_v37, 1 }
 0x17d   : > { %v1152_v46 = vrot.slane %v1151_v38, 1  ;;  %v1164_v47 = vrot.slane %v1163_v39, 1 }
 0x17e   : > { %v1147_v49 = vadd.f32 %v1146_v44, %v1145_v36  ;;  %v1159_v50 = vadd.f32 %v1158_v45, %v1157_v37 }
 0x17f   : > { %v1153_v51 = vadd.f32 %v1152_v46, %v1151_v38  ;;  %v1165_v52 = vadd.f32 %v1164_v47, %v1163_v39 }
 0x180   : > { %v1166_v53 = vmul.f32 0.00390625, %v1147_v49  ;;  %v1168_v54 = vmul.f32 0.00390625, %v1159_v50 }
 0x181   : > { %v1167_v55 = vmul.f32 0.00390625, %v1153_v51  ;;  %v1169_v56 = vmul.f32 0.00390625, %v1165_v52 }
 0x183   : > { %v1174_v58 = vcombine.low %v1166_v53, %v1167_v55  ;;  %v1175_v59 = vcombine.low %v1168_v54, %v1169_v56 }
 0x185   : > { %v1182_v60 = vrot.slane %v1174_v58, %v1181_v57  ;;  %v1189_v61 = vrot.slane %v1175_v59, %v1181_v57 }
 0x187   : > { %v1190_v62 = vcombine.low %v1182_v60, %v1189_v61 }
 0x189   : > { %v1197_v63 = vrot.slane %v1190_v62, %v1181_v57 }
 0x18b   : > { %1203 = vst.msk [vmem:[%s186_s8] sm:$0xf] %vm1201_vm1, %v1197_v63 }
 0x18c   : > { %1481 = shalt.err (!%p1478_p5)
}
 0x18d   : > { %s1482_s26 = scalar_lea.hbm %s1914_s11, 64  ;;  %s1486_s28 = scalar_lea.hbm %s1964_s3, 128 }
 0x18e   : > { %p1483_p6 = scmp.ne.s32.totalorder %s1914_s11, %s1482_s26  ;;  %p1487_p10 = scmp.lt.u32.totalorder %s1914_s11, %s1964_s3 }
 0x18f   : > { %p1488_p11 = scmp.lt.u32.totalorder %s1486_s28, %s1482_s26  ;;  %p1490_p13 = scmp.lt.u32.totalorder %s1482_s26, %s1914_s11 }
 0x190   : > { %p1484_p7 = pnand %p1483_p6, %p1611_p4 }
 0x191   : > { %p1489_p12 = por %p1488_p11, %p1487_p10 }
 0x192   : > { %p1485_p9 = pneg %p1484_p7 }
 0x193   : > { %p1491_p0 = por %p1490_p13, %p1489_p12 }
 0x195   : > { %p1492_p1 = pnand %p1491_p0, %p1485_p9 }
 0x197   : > { %1495 = shalt.err (!%p1492_p1)
}
 0x198   : > { %1371 = dma.vmem_to_hbm [thread:$0]  (%p1611_p4), %s1916_s9, 64, %s1914_s11, %s1205_s18  }
 0x199 PF: > { %p1377_p2 = scmp.ge.s32.totalorder %s1546_s17, 2  ;;  %s1231_s5 = sand.u32 1, %s1526_s12  }
 0x19a   : > { %s1232_s6 = scalar_lea.sflag [#allocation4], %s1231_s5 }
 0x19b   : > { %p1374_p3 = pnand %p1377_p2, %p1618_p8 }
 0x19d   : > { %1521 = dma.done.wait (!%p1374_p3), %s1232_s6, 64  }
 0x19e   : > { %1523 = vsyncadd (!%p1374_p3), %s1232_s6, 4294967232  ;;  %s16_s17 = sadd.s32 1, %s1546_s17   ;;  %s1967_s12 = smov %s1530_s13 }
 0x19f   : > { %p13_p5 = scmp.ge.s32.totalorder %s16_s17, 4   ;;  %s1968_s13 = smov %s1534_s14 }
 0x1a0   : > { %s1969_s14 = smov %s1624_s25  ;;  %s1970_s15 = smov %s1542_s16 }
 0x1a1   : > { %s1971_s16 = smov %s1973_s20  ;;  %15 = sbr.rel (!%p13_p5) target bundleno = 4 (0x4), region = 75 }
 0x1a8   :  { %1237 = vsyncpa [#allocation4], 1 }
 0x1a9   :  { %1239 = vsyncpa [#allocation4 + $0x1], 1 }

</bundles_post_ra>
